<compile_context>
chip_gen: v7x
topology: tpu7x:2x2x1
jax: 0.10.0
libtpu: 0.0.40
codegen_flags: <defaults>
</compile_context>

<pallas_src>
import math

import jax
import jax.numpy as jnp
from jax.experimental import pallas as pl
from jax.experimental.pallas import tpu as pltpu

_SUBLANE = 8                        # vreg sublane height -> batch tiles aligned to this
_LANE = 128                         # vreg lane width     -> N/K tiles aligned to this
_MAX_TB = 512                       # ~85% of HBM roofline per measured tiling table
_TILE_BUDGET = 16 * 1024 * 1024     # per-step working-set budget (fits v5e/v6e/v7x defaults)
_VMEM_LIMIT = 32 * 1024 * 1024      # raised scoped limit, <= physical on all generations
_PALLAS_MIN_FLOPS = 4 * 1024 * 1024 # below this, pallas_call fixed overhead dominates


def _cdiv(a, b):
    return -(-a // b)


def _round_up(n, m):
    return ((n + m - 1) // m) * m


def _kernel_resident(x_ref, w_ref, b_ref, o_ref):
    # x_ref: (tb, in_dim) batch tile; w_ref: (in_dim, out_dim) and b_ref: (1, out_dim)
    # are whole-array VMEM refs (single copy, fetched once before the grid runs).
    acc = jnp.dot(x_ref[...], w_ref[...], preferred_element_type=jnp.float32)
    o_ref[...] = (acc + b_ref[...]).astype(o_ref.dtype)


def _kernel_tiled(x_ref, w_ref, b_ref, o_ref, acc_ref):
    # grid = (batch tiles, N tiles, K tiles); K is last and "arbitrary".
    k = pl.program_id(2)

    @pl.when(k == 0)
    def _():
        acc_ref[...] = jnp.zeros_like(acc_ref)

    acc_ref[...] += jnp.dot(x_ref[...], w_ref[...], preferred_element_type=jnp.float32)

    @pl.when(k == pl.num_programs(2) - 1)
    def _():
        o_ref[...] = (acc_ref[...] + b_ref[...]).astype(o_ref.dtype)


def prepare_params(weight, bias, compute_dtype=None):
    """One-time transform of PyTorch-layout params for the kernel.

    weight (out_dim, in_dim) -> (in_dim, out_dim)  (transposed once, not per call)
    bias   (out_dim,)        -> (1, out_dim) float32
    compute_dtype=jnp.bfloat16 halves the weight/activation HBM stream on
    v6e/v7x (the matmul still accumulates in f32); bias stays f32.
    """
    out_dim, in_dim = weight.shape
    w_t = jnp.asarray(weight).T
    if compute_dtype is not None:
        w_t = w_t.astype(compute_dtype)
    b2 = jnp.asarray(bias, dtype=jnp.float32).reshape(1, out_dim)
    return w_t, b2


def _pick_tb(B, row_bytes, avail_bytes):
    """Largest sublane-aligned batch tile within the VMEM budget, balanced over the
    batch (at most 7 padded rows in the last block) and split into >=2 grid steps
    whenever B allows so v7x's two TensorCores both get work."""
    cap = avail_bytes // max(row_bytes, 1)
    cap = max(_SUBLANE, min(_MAX_TB, (cap // _SUBLANE) * _SUBLANE))
    steps = _cdiv(B, cap)
    if steps == 1 and B > _SUBLANE:
        steps = 2
    return min(cap, _round_up(_cdiv(B, steps), _SUBLANE))


def linear_regression_layer(x, w_prepared, b_prepared, *, use_pallas=None,
                            tb=None, tn=None, tk=None, force_tiled=False):
    """y = x @ weight.T + bias (torch.nn.Linear semantics).

    x:          (B, in_dim)
    w_prepared: (in_dim, out_dim)   from prepare_params (optionally bf16)
    b_prepared: (1, out_dim) float32
    returns     (B, out_dim) in x's original dtype.
    """
    B, in_dim = x.shape
    k_dim, out_dim = w_prepared.shape
    assert k_dim == in_dim, (w_prepared.shape, x.shape)
    out_dtype = x.dtype

    if x.dtype != w_prepared.dtype:          # optional bf16 compute path
        x = x.astype(w_prepared.dtype)

    if use_pallas is None:
        use_pallas = 2 * B * in_dim * out_dim >= _PALLAS_MIN_FLOPS
    if not use_pallas:
        # Tiny-problem gate: plain XLA is strictly faster below the threshold.
        y = jnp.dot(x, w_prepared, preferred_element_type=jnp.float32) + b_prepared
        return y.astype(out_dtype)

    x_b = x.dtype.itemsize
    w_b = w_prepared.dtype.itemsize
    o_b = jnp.dtype(out_dtype).itemsize

    # ---------- resident-weight path (weight + bias live in VMEM, single copy) ----------
    resident_bytes = in_dim * out_dim * w_b + out_dim * 4
    row_bytes_res = 2 * (in_dim * x_b + out_dim * o_b)   # double-buffered x/out rows
    if (not force_tiled) and resident_bytes + _SUBLANE * row_bytes_res <= _TILE_BUDGET:
        if tb is None:
            tb = _pick_tb(B, row_bytes_res, _TILE_BUDGET - resident_bytes)
        grid = (_cdiv(B, tb),)
        return pl.pallas_call(
            _kernel_resident,
            out_shape=jax.ShapeDtypeStruct((B, out_dim), out_dtype),
            grid=grid,
            in_specs=[
                pl.BlockSpec((tb, in_dim), lambda i: (i, 0)),          # batch-tiled x
                pl.BlockSpec(memory_space=pltpu.MemorySpace.VMEM),     # weight: fetched once
                pl.BlockSpec(memory_space=pltpu.MemorySpace.VMEM),     # bias:   fetched once
            ],
            out_specs=pl.BlockSpec((tb, out_dim), lambda i: (i, 0)),
            compiler_params=pltpu.CompilerParams(
                dimension_semantics=("parallel",),
                vmem_limit_bytes=_VMEM_LIMIT,
            ),
        )(x, w_prepared, b_prepared)

    # ---------- tiled path (large in_dim / out_dim): batch x N x K grid + accumulator ----------
    if tn is None:
        tn = min(_round_up(out_dim, _LANE), 4 * _LANE)
    if tk is None:
        if in_dim % _LANE == 0:
            tk = min(in_dim, 4 * _LANE)
            while in_dim % tk:
                tk -= _LANE
        else:
            # TODO(synk): zero-pad K to a 128 multiple for very large non-aligned in_dim.
            tk = in_dim
    assert in_dim % tk == 0, "K tiles must cover in_dim exactly (reduction axis)"

    fixed = 2 * tk * tn * w_b + 2 * tn * 4                 # weight + bias blocks (2 buffers)
    per_row = 2 * tk * x_b + 2 * tn * o_b + tn * 4         # x + out blocks (2 buffers) + acc
    if tb is None:
        tb = _pick_tb(B, per_row, max(_TILE_BUDGET - fixed, _SUBLANE * per_row))

    grid = (_cdiv(B, tb), _cdiv(out_dim, tn), in_dim // tk)
    return pl.pallas_call(
        _kernel_tiled,
        out_shape=jax.ShapeDtypeStruct((B, out_dim), out_dtype),
        grid=grid,
        in_specs=[
            pl.BlockSpec((tb, tk), lambda b, n, k: (b, k)),   # activations
            pl.BlockSpec((tk, tn), lambda b, n, k: (k, n)),   # weight slice
            pl.BlockSpec((1, tn), lambda b, n, k: (0, n)),    # bias slice
        ],
        out_specs=pl.BlockSpec((tb, tn), lambda b, n, k: (b, n)),
        scratch_shapes=[pltpu.VMEM((tb, tn), jnp.float32)],
        compiler_params=pltpu.CompilerParams(
            dimension_semantics=("parallel", "parallel", "arbitrary"),
            vmem_limit_bytes=_VMEM_LIMIT,
        ),
    )(x, w_prepared, b_prepared)


def init_params(key, in_dim, out_dim, gain=1.414):
    """Parameter init matching the PyTorch module's __init__ (PyTorch layout)."""
    k_w, k_b = jax.random.split(key)
    a = gain * math.sqrt(6.0 / (in_dim + out_dim))
    weight = jax.random.uniform(
        k_w, (out_dim, in_dim), dtype=jnp.float32, minval=-a, maxval=a
    )
    bound = 1.0 / math.sqrt(in_dim)
    bias = jax.random.uniform(
        k_b, (out_dim,), dtype=jnp.float32, minval=-bound, maxval=bound
    )
    return weight, bias


if __name__ == "__main__":
    key = jax.random.PRNGKey(0)
    k_x, k_p, k_x2, k_p2 = jax.random.split(key, 4)

    # ---- 1) shipped toy shape, f32, resident-weight path (forced so the kernel runs) ----
    batch, in_dim, out_dim = 8, 32, 16
    x = jax.random.normal(k_x, (batch, in_dim), dtype=jnp.float32)
    weight, bias = init_params(k_p, in_dim, out_dim)
    w_prep, b_prep = prepare_params(weight, bias)

    y = jax.block_until_ready(linear_regression_layer(x, w_prep, b_prep, use_pallas=True))
    y_ref = x @ weight.T + bias
    assert y.shape == (batch, out_dim)
    assert jnp.allclose(y, y_ref, atol=1e-4, rtol=1e-4)

    # auto gate: this tiny shape falls back to plain XLA (same numerics)
    y_auto = jax.block_until_ready(linear_regression_layer(x, w_prep, b_prep))
    assert jnp.allclose(y_auto, y_ref, atol=1e-4, rtol=1e-4)

    # ---- 2) bf16 compute path (halves the HBM stream on v6e/v7x) ----
    w_bf, b_bf = prepare_params(weight, bias, compute_dtype=jnp.bfloat16)
    y_bf = jax.block_until_ready(
        linear_regression_layer(x, w_bf, b_bf, use_pallas=True))
    assert y_bf.dtype == jnp.float32
    assert jnp.allclose(y_bf, y_ref, atol=5e-2, rtol=5e-2)

    # ---- 3) tiled (batch x N x K) path with partial last batch/N blocks, still small ----
    b2, d_in2, d_out2 = 20, 256, 200
    x2 = jax.random.normal(k_x2, (b2, d_in2), dtype=jnp.float32)
    w2, bias2 = init_params(k_p2, d_in2, d_out2)
    w2_prep, b2_prep = prepare_params(w2, bias2)
    y2 = jax.block_until_ready(
        linear_regression_layer(x2, w2_prep, b2_prep, use_pallas=True,
                                force_tiled=True, tb=8, tn=128, tk=128))
    y2_ref = x2 @ w2.T + bias2
    assert y2.shape == (b2, d_out2)
    assert jnp.allclose(y2, y2_ref, atol=2e-2, rtol=2e-2)

    print("KERNEL_OK")
</pallas_src>

<mosaic_0001>
module attributes {stable_mosaic.version = 11 : i64} {
  func.func @_kernel_resident(%arg0: i32, %arg1: memref<8x32xf32, #tpu.memory_space<vmem>>, %arg2: memref<32x16xf32, #tpu.memory_space<vmem>>, %arg3: memref<1x16xf32, #tpu.memory_space<vmem>>, %arg4: memref<8x16xf32, #tpu.memory_space<vmem>>) attributes {dimension_semantics = [#tpu.dimension_semantics<parallel>], iteration_bounds = array<i64: 1>, scalar_prefetch = 0 : i64, scratch_operands = 0 : i64, tpu.core_type = #tpu.core_type<tc>, window_params = [{transform_indices = @transform_0, window_bounds = array<i64: 8, 32>}, {pipeline_mode = #tpu.pipeline_mode<synchronous>, transform_indices = @transform_1, window_bounds = array<i64: 32, 16>}, {pipeline_mode = #tpu.pipeline_mode<synchronous>, transform_indices = @transform_2, window_bounds = array<i64: 1, 16>}, {transform_indices = @transform_3, window_bounds = array<i64: 8, 16>}]} {
    %c0 = arith.constant 0 : index
    %c0_0 = arith.constant 0 : index
    %0 = vector.load %arg1[%c0, %c0_0] : memref<8x32xf32, #tpu.memory_space<vmem>>, vector<8x32xf32>
    %c0_1 = arith.constant 0 : index
    %c0_2 = arith.constant 0 : index
    %1 = vector.load %arg2[%c0_1, %c0_2] : memref<32x16xf32, #tpu.memory_space<vmem>>, vector<32x16xf32>
    %cst = arith.constant dense<0.000000e+00> : vector<8x16xf32>
    %2 = tpu.matmul %0, %1, %cst {dimension_numbers = #tpu.dot_dimension_numbers<[1], [0], [0], [1], [0, 0, 1, 1], [], []>} : vector<8x32xf32>, vector<32x16xf32>, vector<8x16xf32> -> vector<8x16xf32>
    %c0_3 = arith.constant 0 : index
    %c0_4 = arith.constant 0 : index
    %3 = vector.load %arg3[%c0_3, %c0_4] : memref<1x16xf32, #tpu.memory_space<vmem>>, vector<1x16xf32>
    %4 = vector.broadcast %3 : vector<1x16xf32> to vector<8x16xf32>
    %5 = arith.addf %2, %4 : vector<8x16xf32>
    %c0_5 = arith.constant 0 : index
    %c0_6 = arith.constant 0 : index
    %6 = vector.load %arg4[%c0_5, %c0_6] : memref<8x16xf32, #tpu.memory_space<vmem>>, vector<8x16xf32>
    tpu.vector_store %arg4[%c0_5, %c0_6], %5 {strides = array<i32>} : memref<8x16xf32, #tpu.memory_space<vmem>>, vector<8x16xf32>,
    return
  }
  func.func @transform_0(%arg0: i32) -> (i32, i32) {
    %c0_i32 = arith.constant 0 : i32
    %c0_i32_0 = arith.constant 0 : i32
    return %arg0, %c0_i32 : i32, i32
  }
  func.func @transform_1(%arg0: i32) -> (i32, i32) {
    %c0_i32 = arith.constant 0 : i32
    %c0_i32_0 = arith.constant 0 : i32
    %c0_i32_1 = arith.constant 0 : i32
    return %c0_i32, %c0_i32_0 : i32, i32
  }
  func.func @transform_2(%arg0: i32) -> (i32, i32) {
    %c0_i32 = arith.constant 0 : i32
    %c0_i32_0 = arith.constant 0 : i32
    %c0_i32_1 = arith.constant 0 : i32
    return %c0_i32, %c0_i32_0 : i32, i32
  }
  func.func @transform_3(%arg0: i32) -> (i32, i32) {
    %c0_i32 = arith.constant 0 : i32
    %c0_i32_0 = arith.constant 0 : i32
    return %arg0, %c0_i32 : i32, i32
  }
}

</mosaic_0001>

<bundles_post_ra>
// kernel: tpu_custom_call.1
= control target key start
LH: loop header
LB: loop body
LE: loop exit
PB: predicated region body
PF: predicated region fallthrough
CT: control target
= control target key end

     0   :  { %v169_v3 = vmov 0.0|0.0   ;;  %vm170_vm0 = vmmov 0   ;;  %v171_v6 = vmov 0.0   ;;  %s223_s0 = inlined_call_operand.vmem [shape: f32[8,32], index: 0, kind: input, shape index: {}]   ;;  %s224_s1 = inlined_call_operand.vmem [shape: f32[32,16], index: 1, kind: input, shape index: {}]   ;;  %s225_s2 = inlined_call_operand.vmem [shape: f32[1,16], index: 2, kind: input, shape index: {}]   ;;  %s226_s3 = inlined_call_operand.hbm [shape: f32[8,16], index: 3, kind: output, shape index: {}]  }
   0x1   :  { %v16_v0 = vld [vmem:[%s224_s1] sm:$0xff]  ;;  %v17_v1 = vld [vmem:[%s224_s1 + $0x8] sm:$0xff]  ;;  %v18_v2 = vld [vmem:[%s224_s1 + $0x10] sm:$0xff]  ;;  %135 = vmatprep.subr.bf16.mxu0 %v169_v3  ;;  %132 = vmatprep.mubr.msk.f32.mxu0 %vm170_vm0, %v171_v6 }
   0x2   :  { %v136_v4 = vpack.c.bf16 %v17_v1, %v16_v0  ;;  %v19_v5 = vld [vmem:[%s224_s1 + $0x18] sm:$0xff] }
   0x3   :  { %8 = vsyncpa [#allocation3], 0  ;;  %v139_v7 = vpack.c.bf16 %v19_v5, %v18_v2  ;;  %v15_v8 = vld [vmem:[%s223_s0] sm:$0xff]  ;;  %vm27_vm1 = vcmask 261120   ;;  %s172_s24 = smov [#allocation2]   ;;  %vm101_vm2 = vcmask 130048  }
   0x4   :  { %137 = vmatpush3.bf16.msra.mxu0 %v136_v4  ;;  %v117_v9 = vld [vmem:[%s225_s2] ss:$0 sm:$0xff]  ;;  %s109_s1 = sshll.u32 %s172_s24, 4  ;;  %s110_s1 = int_to_ptr.vmem [resolvable:$true] %s109_s1 }
   0x5   :  { %138 = vmatprep.subr.bf16.mxu0 %v169_v3  ;;  %s145_s25 = scalar_lea.vmem %s110_s1, 128  ;;  %p150_p1 = scmp.lt.s32.totalorder %s110_s1, %s110_s1 }
   0x6   :  { %p146_p0 = scmp.ne.s32.totalorder %s110_s1, %s145_s25  ;;  %p151_p2 = scmp.lt.s32.totalorder %s145_s25, %s145_s25 }
   0x8   :  { %140 = vmatpush3.bf16.msra.mxu0 %v139_v7  ;;  %p152_p3 = por %p151_p2, %p150_p1 }
   0xa   :  { %p153_p4 = pnand %p152_p3, %p146_p0 }
   0xb   :  { %133 = vmatmul.mubr.msk.f32.vlgmr.msra.gmra.mrb[0].mxu0 %vm27_vm1, %v15_v8 }
  0xde   :  { %v97_v10 = vpop.f32.mrb[0].mxu0 }
  0xdf   :  { %v98_v11 = vadd.f32 %v117_v9, %v97_v10  ;;  %v134_v12 = vpop.f32.mrb[1].mxu0 }
  0xe1   :  { %102 = vst.msk [vmem:[#allocation2] sm:$0xff] %vm101_vm2, %v98_v11 }
  0xe2   :  { %156 = shalt.err (!%p153_p4)
}
  0xe3   :  { %s157_s27 = scalar_lea.hbm %s226_s3, 128 }
  0xe4   :  { %p158_p5 = scmp.ne.s32.totalorder %s226_s3, %s157_s27  ;;  %p161_p6 = scmp.lt.u32.totalorder %s157_s27, %s226_s3 }
  0xe6   :  { %p163_p7 = pnand %p161_p6, %p158_p5 }
  0xe8   :  { %166 = shalt.err (!%p163_p7)
}
  0xe9   :  { %112 = dma.vmem_to_hbm [thread:$0]  %s110_s1, 128, %s226_s3, [#allocation3]  }
  0xea   :  { %167 = dma.done.wait [#allocation3], 128  }
  0xeb   :  { %168 = vsyncadd [#allocation3], 4294967168 }
  0xec   :  { %116 = vsyncpa [#allocation3], 1 }

</bundles_post_ra>
